<compile_context>
chip_gen: v5e
topology: v5e:2x2
jax: 0.10.0
libtpu: 0.0.40
codegen_flags: <defaults>
</compile_context>

<pallas_src>
import jax
import jax.numpy as jnp
from jax.experimental import pallas as pl
from jax.experimental.pallas import tpu as pltpu

A = 100.0  # compliance-like constant from the reference module


def _round_up(x, m):
    return ((x + m - 1) // m) * m


def _grasp_kernel(cd_ref, vg_ref, gp_ref, vw_ref, l_ref, vout_ref, lout_ref):
    # cd_ref  : (1, KT)      rest distances (resident across batch tiles)
    # vg_ref  : (3, TB, KT)  gathered predicted positions (x/y/z planes)
    # gp_ref  : (3, TB, KT)  grasp target points (x/y/z planes)
    # vw_ref  : (TB, KT)     inverse weights of grasped vertices
    # l_ref   : (TB, KT)     Lagrange multipliers
    # vout_ref: (3, TB, KT)  updated positions (x/y/z planes)
    # lout_ref: (TB, KT)     updated Lagrange multipliers
    nx = vg_ref[0] - gp_ref[0]
    ny = vg_ref[1] - gp_ref[1]
    nz = vg_ref[2] - gp_ref[2]
    sum_sq = nx * nx + ny * ny + nz * nz                 # (TB, KT) — pure VPU
    inv_d = jax.lax.rsqrt(sum_sq)                        # single EUP op
    d = sum_sq * inv_d                                   # == sqrt(sum_sq), one VPU mul
    c = d - cd_ref[...]                                  # (TB,KT) - (1,KT) broadcast

    vw = vw_ref[...]
    l = l_ref[...]
    # Reference: S[S==0] = inf; L_delta = (-C - A*L) / (S + A).
    # With vw == 0 the reference result is exactly 0, so guard with a where and
    # use an EUP reciprocal instead of a VPU divide on the hot path.
    inv_s = pl.reciprocal(vw + A, approx=False)
    l_delta = jnp.where(vw == 0.0, 0.0, (-c - A * l) * inv_s)

    scale = vw * l_delta * inv_d                         # V_w * L_delta / |N|
    vout_ref[0] = vg_ref[0] + scale * nx                 # full unmasked plane stores
    vout_ref[1] = vg_ref[1] + scale * ny
    vout_ref[2] = vg_ref[2] + scale * nz
    lout_ref[...] = l + l_delta


def _project_c_grasp_batch_impl(V_predict, L, grasp_points, V_w, C_grasp, C_grasp_d):
    B = V_predict.shape[0]
    K = int(C_grasp.shape[0])

    # --- tiling: lanes = constraints (mult of 128), sublanes = batch (mult of 8)
    Kp = _round_up(K, 128)
    Bp = _round_up(B, 8)
    TB = 8
    for cand in (64, 56, 48, 40, 32, 24, 16, 8):   # largest 8-multiple dividing Bp
        if Bp % cand == 0:
            TB = cand
            break
    KT = 128
    for cand in (512, 384, 256, 128):              # largest 128-multiple dividing Kp
        if Kp % cand == 0:
            KT = cand
            break
    grid = (Bp // TB, Kp // KT)

    # --- glue: gather constrained rows (plain JAX; tiny index set) ---
    Vg = jnp.take(V_predict, C_grasp, axis=1)              # (B, K, 3)
    Vw_g = jnp.take(V_w, C_grasp, axis=1)                   # (B, K, 1)

    def planes(x):
        # (B, K, 3) -> (3, Bp, Kp): x/y/z planes, batch on sublanes, K on lanes.
        x = jnp.transpose(x, (2, 0, 1)).astype(jnp.float32)
        return jnp.pad(x, ((0, 0), (0, Bp - B), (0, Kp - K)))

    def mat(x):
        # (B, K, 1) -> (Bp, Kp)
        x = x[..., 0].astype(jnp.float32)
        return jnp.pad(x, ((0, Bp - B), (0, Kp - K)))

    vg = planes(Vg)                                         # (3, Bp, Kp)
    gp = planes(grasp_points)                               # (3, Bp, Kp)
    vw = mat(Vw_g)                                          # (Bp, Kp)
    lmul = mat(L)                                           # (Bp, Kp)
    cd = jnp.pad(C_grasp_d.astype(jnp.float32)[:, 0][None, :],
                 ((0, 0), (0, Kp - K)))                     # (1, Kp)

    spec_cd = pl.BlockSpec((1, KT), lambda bi, kj: (0, kj))       # resident over batch
    spec_v = pl.BlockSpec((3, TB, KT), lambda bi, kj: (0, bi, kj))
    spec_s = pl.BlockSpec((TB, KT), lambda bi, kj: (bi, kj))

    vout, lout = pl.pallas_call(
        _grasp_kernel,
        grid=grid,
        in_specs=[spec_cd, spec_v, spec_v, spec_s, spec_s],
        out_specs=[spec_v, spec_s],
        out_shape=(jax.ShapeDtypeStruct((3, Bp, Kp), jnp.float32),
                   jax.ShapeDtypeStruct((Bp, Kp), jnp.float32)),
        compiler_params=pltpu.CompilerParams(
            dimension_semantics=("parallel", "parallel")),
    )(cd, vg, gp, vw, lmul)

    new_Vg = jnp.transpose(vout[:, :B, :K], (1, 2, 0))      # (B, K, 3)
    L_new = lout[:B, :K][..., None].astype(L.dtype)         # (B, K, 1)

    # --- glue: scatter updated rows back (C_grasp assumed unique, matching the
    # reference `V_predict_new[:, C_grasp] += ...` semantics) ---
    V_predict_new = V_predict.at[:, C_grasp].set(new_Vg.astype(V_predict.dtype))
    return V_predict_new, L_new


project_c_grasp_batch = jax.jit(_project_c_grasp_batch_impl)


def _reference(V_predict, L, grasp_points, V_w, C_grasp, C_grasp_d):
    # Pure-JAX transcription of the PyTorch forward for verification.
    Vg = V_predict[:, C_grasp]
    N = Vg - grasp_points
    D = jnp.sqrt(jnp.sum(N * N, axis=-1, keepdims=True))
    C = D - C_grasp_d[None, :, :]
    N_norm = N / D
    S = V_w[:, C_grasp]
    S = jnp.where(S == 0.0, jnp.inf, S)
    L_delta = (-C - A * L) / (S + A)
    L_new = L + L_delta
    V_new = V_predict.at[:, C_grasp].set(Vg + V_w[:, C_grasp] * L_delta * N_norm)
    return V_new, L_new


if __name__ == "__main__":
    key = jax.random.PRNGKey(0)
    k1, k2, k3, k4, k5 = jax.random.split(key, 5)

    B, Nv, K = 2, 16, 4

    V_predict = jax.random.normal(k1, (B, Nv, 3), dtype=jnp.float32)
    grasp_points = jax.random.normal(k2, (B, K, 3), dtype=jnp.float32)
    L = 0.1 * jax.random.normal(k3, (B, K, 1), dtype=jnp.float32)
    V_w = jax.random.uniform(k4, (B, Nv, 1), dtype=jnp.float32)
    # exercise the S == 0 -> inf path on one constrained vertex
    V_w = V_w.at[0, 5, 0].set(0.0)
    C_grasp = jnp.array([1, 5, 9, 14], dtype=jnp.int32)
    C_grasp_d = 0.05 * jax.random.uniform(k5, (K, 1), dtype=jnp.float32)

    V_new, L_new = project_c_grasp_batch(
        V_predict, L, grasp_points, V_w, C_grasp, C_grasp_d
    )
    jax.block_until_ready((V_new, L_new))

    V_ref, L_ref = _reference(V_predict, L, grasp_points, V_w, C_grasp, C_grasp_d)

    assert jnp.allclose(V_new, V_ref, atol=1e-5, rtol=1e-5)
    assert jnp.allclose(L_new, L_ref, atol=1e-5, rtol=1e-5)

    print("KERNEL_OK")
</pallas_src>

<mosaic_0001>
module attributes {stable_mosaic.version = 11 : i64} {
  func.func @_grasp_kernel(%arg0: i32, %arg1: i32, %arg2: memref<1x128xf32, #tpu.memory_space<vmem>>, %arg3: memref<3x8x128xf32, #tpu.memory_space<vmem>>, %arg4: memref<3x8x128xf32, #tpu.memory_space<vmem>>, %arg5: memref<8x128xf32, #tpu.memory_space<vmem>>, %arg6: memref<8x128xf32, #tpu.memory_space<vmem>>, %arg7: memref<3x8x128xf32, #tpu.memory_space<vmem>>, %arg8: memref<8x128xf32, #tpu.memory_space<vmem>>) attributes {dimension_semantics = [#tpu.dimension_semantics<parallel>, #tpu.dimension_semantics<parallel>], iteration_bounds = array<i64: 1, 1>, scalar_prefetch = 0 : i64, scratch_operands = 0 : i64, tpu.core_type = #tpu.core_type<tc>, window_params = [{transform_indices = @transform_0, window_bounds = array<i64: 1, 128>}, {transform_indices = @transform_1, window_bounds = array<i64: 3, 8, 128>}, {transform_indices = @transform_2, window_bounds = array<i64: 3, 8, 128>}, {transform_indices = @transform_3, window_bounds = array<i64: 8, 128>}, {transform_indices = @transform_4, window_bounds = array<i64: 8, 128>}, {transform_indices = @transform_5, window_bounds = array<i64: 3, 8, 128>}, {transform_indices = @transform_6, window_bounds = array<i64: 8, 128>}]} {
    %c0 = arith.constant 0 : index
    %c0_0 = arith.constant 0 : index
    %c0_1 = arith.constant 0 : index
    %0 = vector.load %arg3[%c0, %c0_0, %c0_1] : memref<3x8x128xf32, #tpu.memory_space<vmem>>, vector<1x8x128xf32>
    %1 = vector.shape_cast %0 : vector<1x8x128xf32> to vector<8x128xf32>
    %c0_2 = arith.constant 0 : index
    %c0_3 = arith.constant 0 : index
    %c0_4 = arith.constant 0 : index
    %2 = vector.load %arg4[%c0_2, %c0_3, %c0_4] : memref<3x8x128xf32, #tpu.memory_space<vmem>>, vector<1x8x128xf32>
    %3 = vector.shape_cast %2 : vector<1x8x128xf32> to vector<8x128xf32>
    %4 = arith.subf %1, %3 : vector<8x128xf32>
    %c1 = arith.constant 1 : index
    %c0_5 = arith.constant 0 : index
    %c0_6 = arith.constant 0 : index
    %5 = vector.load %arg3[%c1, %c0_5, %c0_6] : memref<3x8x128xf32, #tpu.memory_space<vmem>>, vector<1x8x128xf32>
    %6 = vector.shape_cast %5 : vector<1x8x128xf32> to vector<8x128xf32>
    %c1_7 = arith.constant 1 : index
    %c0_8 = arith.constant 0 : index
    %c0_9 = arith.constant 0 : index
    %7 = vector.load %arg4[%c1_7, %c0_8, %c0_9] : memref<3x8x128xf32, #tpu.memory_space<vmem>>, vector<1x8x128xf32>
    %8 = vector.shape_cast %7 : vector<1x8x128xf32> to vector<8x128xf32>
    %9 = arith.subf %6, %8 : vector<8x128xf32>
    %c2 = arith.constant 2 : index
    %c0_10 = arith.constant 0 : index
    %c0_11 = arith.constant 0 : index
    %10 = vector.load %arg3[%c2, %c0_10, %c0_11] : memref<3x8x128xf32, #tpu.memory_space<vmem>>, vector<1x8x128xf32>
    %11 = vector.shape_cast %10 : vector<1x8x128xf32> to vector<8x128xf32>
    %c2_12 = arith.constant 2 : index
    %c0_13 = arith.constant 0 : index
    %c0_14 = arith.constant 0 : index
    %12 = vector.load %arg4[%c2_12, %c0_13, %c0_14] : memref<3x8x128xf32, #tpu.memory_space<vmem>>, vector<1x8x128xf32>
    %13 = vector.shape_cast %12 : vector<1x8x128xf32> to vector<8x128xf32>
    %14 = arith.subf %11, %13 : vector<8x128xf32>
    %15 = arith.mulf %4, %4 : vector<8x128xf32>
    %16 = arith.mulf %9, %9 : vector<8x128xf32>
    %17 = arith.addf %15, %16 : vector<8x128xf32>
    %18 = arith.mulf %14, %14 : vector<8x128xf32>
    %19 = arith.addf %17, %18 : vector<8x128xf32>
    %20 = math.rsqrt %19 : vector<8x128xf32>
    %21 = arith.mulf %19, %20 : vector<8x128xf32>
    %c0_15 = arith.constant 0 : index
    %c0_16 = arith.constant 0 : index
    %22 = vector.load %arg2[%c0_15, %c0_16] : memref<1x128xf32, #tpu.memory_space<vmem>>, vector<1x128xf32>
    %23 = vector.broadcast %22 : vector<1x128xf32> to vector<8x128xf32>
    %24 = arith.subf %21, %23 : vector<8x128xf32>
    %c0_17 = arith.constant 0 : index
    %c0_18 = arith.constant 0 : index
    %25 = vector.load %arg5[%c0_17, %c0_18] : memref<8x128xf32, #tpu.memory_space<vmem>>, vector<8x128xf32>
    %c0_19 = arith.constant 0 : index
    %c0_20 = arith.constant 0 : index
    %26 = vector.load %arg6[%c0_19, %c0_20] : memref<8x128xf32, #tpu.memory_space<vmem>>, vector<8x128xf32>
    %cst = arith.constant 1.000000e+02 : f32
    %27 = vector.broadcast %cst : f32 to vector<8x128xf32>
    %28 = arith.addf %25, %27 : vector<8x128xf32>
    %29 = tpu.reciprocal %28 : vector<8x128xf32> -> vector<8x128xf32>
    %cst_21 = arith.constant 0.000000e+00 : f32
    %30 = vector.broadcast %cst_21 : f32 to vector<8x128xf32>
    %31 = arith.cmpf oeq, %25, %30 : vector<8x128xf32>
    %cst_22 = arith.constant 0.000000e+00 : f32
    %32 = vector.broadcast %cst_22 : f32 to vector<8x128xf32>
    %33 = arith.subf %32, %24 : vector<8x128xf32>
    %cst_23 = arith.constant 1.000000e+02 : f32
    %34 = vector.broadcast %cst_23 : f32 to vector<8x128xf32>
    %35 = arith.mulf %34, %26 : vector<8x128xf32>
    %36 = arith.subf %33, %35 : vector<8x128xf32>
    %37 = arith.mulf %36, %29 : vector<8x128xf32>
    %cst_24 = arith.constant 0.000000e+00 : f32
    %38 = vector.broadcast %cst_24 : f32 to vector<8x128xf32>
    %39 = arith.select %31, %38, %37 : vector<8x128xi1>, vector<8x128xf32>
    %40 = arith.mulf %25, %39 : vector<8x128xf32>
    %41 = arith.mulf %40, %20 : vector<8x128xf32>
    %c0_25 = arith.constant 0 : index
    %c0_26 = arith.constant 0 : index
    %c0_27 = arith.constant 0 : index
    %42 = vector.load %arg3[%c0_25, %c0_26, %c0_27] : memref<3x8x128xf32, #tpu.memory_space<vmem>>, vector<1x8x128xf32>
    %43 = vector.shape_cast %42 : vector<1x8x128xf32> to vector<8x128xf32>
    %44 = arith.mulf %41, %4 : vector<8x128xf32>
    %45 = arith.addf %43, %44 : vector<8x128xf32>
    %c0_28 = arith.constant 0 : index
    %c0_29 = arith.constant 0 : index
    %c0_30 = arith.constant 0 : index
    %46 = vector.load %arg7[%c0_28, %c0_29, %c0_30] : memref<3x8x128xf32, #tpu.memory_space<vmem>>, vector<1x8x128xf32>
    %47 = vector.shape_cast %46 : vector<1x8x128xf32> to vector<8x128xf32>
    %48 = vector.shape_cast %45 : vector<8x128xf32> to vector<1x8x128xf32>
    tpu.vector_store %arg7[%c0_28, %c0_29, %c0_30], %48 {strides = array<i32>} : memref<3x8x128xf32, #tpu.memory_space<vmem>>, vector<1x8x128xf32>,
    %c1_31 = arith.constant 1 : index
    %c0_32 = arith.constant 0 : index
    %c0_33 = arith.constant 0 : index
    %49 = vector.load %arg3[%c1_31, %c0_32, %c0_33] : memref<3x8x128xf32, #tpu.memory_space<vmem>>, vector<1x8x128xf32>
    %50 = vector.shape_cast %49 : vector<1x8x128xf32> to vector<8x128xf32>
    %51 = arith.mulf %41, %9 : vector<8x128xf32>
    %52 = arith.addf %50, %51 : vector<8x128xf32>
    %c1_34 = arith.constant 1 : index
    %c0_35 = arith.constant 0 : index
    %c0_36 = arith.constant 0 : index
    %53 = vector.load %arg7[%c1_34, %c0_35, %c0_36] : memref<3x8x128xf32, #tpu.memory_space<vmem>>, vector<1x8x128xf32>
    %54 = vector.shape_cast %53 : vector<1x8x128xf32> to vector<8x128xf32>
    %55 = vector.shape_cast %52 : vector<8x128xf32> to vector<1x8x128xf32>
    tpu.vector_store %arg7[%c1_34, %c0_35, %c0_36], %55 {strides = array<i32>} : memref<3x8x128xf32, #tpu.memory_space<vmem>>, vector<1x8x128xf32>,
    %c2_37 = arith.constant 2 : index
    %c0_38 = arith.constant 0 : index
    %c0_39 = arith.constant 0 : index
    %56 = vector.load %arg3[%c2_37, %c0_38, %c0_39] : memref<3x8x128xf32, #tpu.memory_space<vmem>>, vector<1x8x128xf32>
    %57 = vector.shape_cast %56 : vector<1x8x128xf32> to vector<8x128xf32>
    %58 = arith.mulf %41, %14 : vector<8x128xf32>
    %59 = arith.addf %57, %58 : vector<8x128xf32>
    %c2_40 = arith.constant 2 : index
    %c0_41 = arith.constant 0 : index
    %c0_42 = arith.constant 0 : index
    %60 = vector.load %arg7[%c2_40, %c0_41, %c0_42] : memref<3x8x128xf32, #tpu.memory_space<vmem>>, vector<1x8x128xf32>
    %61 = vector.shape_cast %60 : vector<1x8x128xf32> to vector<8x128xf32>
    %62 = vector.shape_cast %59 : vector<8x128xf32> to vector<1x8x128xf32>
    tpu.vector_store %arg7[%c2_40, %c0_41, %c0_42], %62 {strides = array<i32>} : memref<3x8x128xf32, #tpu.memory_space<vmem>>, vector<1x8x128xf32>,
    %63 = arith.addf %26, %39 : vector<8x128xf32>
    %c0_43 = arith.constant 0 : index
    %c0_44 = arith.constant 0 : index
    %64 = vector.load %arg8[%c0_43, %c0_44] : memref<8x128xf32, #tpu.memory_space<vmem>>, vector<8x128xf32>
    tpu.vector_store %arg8[%c0_43, %c0_44], %63 {strides = array<i32>} : memref<8x128xf32, #tpu.memory_space<vmem>>, vector<8x128xf32>,
    return
  }
  func.func @transform_0(%arg0: i32, %arg1: i32) -> (i32, i32) {
    %c0_i32 = arith.constant 0 : i32
    %c0_i32_0 = arith.constant 0 : i32
    return %c0_i32, %arg1 : i32, i32
  }
  func.func @transform_1(%arg0: i32, %arg1: i32) -> (i32, i32, i32) {
    %c0_i32 = arith.constant 0 : i32
    %c0_i32_0 = arith.constant 0 : i32
    return %c0_i32, %arg0, %arg1 : i32, i32, i32
  }
  func.func @transform_2(%arg0: i32, %arg1: i32) -> (i32, i32, i32) {
    %c0_i32 = arith.constant 0 : i32
    %c0_i32_0 = arith.constant 0 : i32
    return %c0_i32, %arg0, %arg1 : i32, i32, i32
  }
  func.func @transform_3(%arg0: i32, %arg1: i32) -> (i32, i32) {
    %c0_i32 = arith.constant 0 : i32
    return %arg0, %arg1 : i32, i32
  }
  func.func @transform_4(%arg0: i32, %arg1: i32) -> (i32, i32) {
    %c0_i32 = arith.constant 0 : i32
    return %arg0, %arg1 : i32, i32
  }
  func.func @transform_5(%arg0: i32, %arg1: i32) -> (i32, i32, i32) {
    %c0_i32 = arith.constant 0 : i32
    %c0_i32_0 = arith.constant 0 : i32
    return %c0_i32, %arg0, %arg1 : i32, i32, i32
  }
  func.func @transform_6(%arg0: i32, %arg1: i32) -> (i32, i32) {
    %c0_i32 = arith.constant 0 : i32
    return %arg0, %arg1 : i32, i32
  }
}

</mosaic_0001>

<bundles_post_ra>
// kernel: _project_c_grasp_batch_impl.1
= control target key start
LH: loop header
LB: loop body
LE: loop exit
PB: predicated region body
PF: predicated region fallthrough
CT: control target
= control target key end

     0   :  { %s195_s1 = inlined_call_operand.vmem [shape: f32[3,8,128], index: 1, kind: input, shape index: {}]   ;;  %s196_s2 = inlined_call_operand.vmem [shape: f32[3,8,128], index: 2, kind: input, shape index: {}]   ;;  %s197_s3 = inlined_call_operand.vmem [shape: f32[8,128], index: 3, kind: input, shape index: {}]   ;;  %s198_s0 = inlined_call_operand.vmem [shape: f32[1,128], index: 0, kind: input, shape index: {}]   ;;  %s199_s4 = inlined_call_operand.vmem [shape: f32[8,128], index: 4, kind: input, shape index: {}]   ;;  %s200_s6 = inlined_call_operand.vmem [shape: f32[8,128], index: 6, kind: output, shape index: {1}]   ;;  %s201_s5 = inlined_call_operand.vmem [shape: f32[3,8,128], index: 5, kind: output, shape index: {0}]  }
   0x1   :  { %v155_v0 = vld [vmem:[%s195_s1] sm:$0xff]  ;;  %v104_v2 = vld [vmem:[%s195_s1 + $0x8] sm:$0xff]  ;;  %v106_v5 = vld [vmem:[%s195_s1 + $0x10] sm:$0xff] }
   0x2   :  { %v23_v1 = vld [vmem:[%s196_s2] sm:$0xff]  ;;  %v105_v4 = vld [vmem:[%s196_s2 + $0x8] sm:$0xff]  ;;  %v107_v6 = vld [vmem:[%s196_s2 + $0x10] sm:$0xff] }
   0x3   :  { %v24_v3 = vsub.f32 %v155_v0, %v23_v1  ;;  %v29_v7 = vsub.f32 %v104_v2, %v105_v4  ;;  %v34_v8 = vsub.f32 %v106_v5, %v107_v6  ;;  %v56_v9 = vld [vmem:[%s197_s3] sm:$0xff] }
   0x4   :  { %v58_v11 = vadd.f32 100.0, %v56_v9  ;;  %v112_v27 = vld [vmem:[%s198_s0] ss:$0 sm:$0xff]  ;;  %vm73_vm7 = vcmp.eq.f32.partialorder %v56_v9, 0.0 }
   0x5   :  { %v35_v10 = vmul.f32 %v24_v3, %v24_v3  ;;  %v36_v12 = vmul.f32 %v29_v7, %v29_v7  ;;  %v38_v13 = vmul.f32 %v34_v8, %v34_v8  ;;  %v57_v31 = vld [vmem:[%s199_s4] sm:$0xff] }
   0x6   :  { %113 = vrcp.f32 %v58_v11  ;;  %vm64_vm3 = vweird.f32 %v58_v11  ;;  %v70_v26 = vand.u32 2147483648, %v58_v11  ;;  %v68_v29 = vand.u32 2147483647, %v58_v11 }
   0x7   :  { %v37_v14 = vadd.f32 %v36_v12, %v35_v10  ;;  %v75_v36 = vmul.f32 100.0, %v57_v31 }
   0x8   :  { %v71_v33 = vor.u32 1.1754944e-38, %v70_v26  ;;  %vm69_vm6 = vcmp.eq.f32.partialorder %v68_v29, 8.507059e+37 }
   0x9   :  { %v39_v15 = vadd.f32 %v38_v13, %v37_v14 }
   0xb   :  { %115 = vrsqrt.f32 %v39_v15  ;;  %vm46_vm0 = vweird.f32 %v39_v15 }
   0xc   :  { %v114_v16 = vpop.eup %113 }
   0xd   :  { %v60_v17 = vmul.f32 %v114_v16, %v58_v11  ;;  %vm65_vm4 = vweird.f32 %v114_v16 }
   0xe   :  { %vm66_vm5 = vmor %vm64_vm3, %vm65_vm4 }
   0xf   :  { %v61_v20 = vsub.f32 1.0, %v60_v17 }
  0x11   :  { %v116_v18 = vpop.eup %115  ;;  %v62_v23 = vmul.f32 %v114_v16, %v61_v20 }
  0x12   :  { %v41_v19 = vmul.f32 %v116_v18, %v39_v15  ;;  %vm47_vm1 = vweird.f32 %v116_v18 }
  0x13   :  { %vm48_vm2 = vmor %vm46_vm0, %vm47_vm1  ;;  %v63_v28 = vadd.f32 %v114_v16, %v62_v23 }
  0x14   :  { %v42_v21 = vmul.f32 %v116_v18, %v41_v19 }
  0x15   :  { %v67_v35 = vsel %vm66_vm5, %v114_v16, %v63_v28 }
  0x16   :  { %v43_v22 = vmul.f32 0.5, %v42_v21  ;;  %v72_v38 = vsel %vm69_vm6, %v71_v33, %v67_v35 }
  0x18   :  { %v44_v24 = vsub.f32 1.5, %v43_v22 }
  0x1a   :  { %v45_v25 = vmul.f32 %v116_v18, %v44_v24 }
  0x1c   :  { %v49_v30 = vsel %vm48_vm2, %v116_v18, %v45_v25 }
  0x1d   :  { %v50_v32 = vmul.f32 %v49_v30, %v39_v15 }
  0x1f   :  { %v55_v34 = vsub.f32 %v50_v32, %v112_v27 }
  0x21   :  { %v74_v37 = vsub.f32 0.0, %v55_v34 }
  0x23   :  { %v76_v39 = vsub.f32 %v74_v37, %v75_v36 }
  0x25   :  { %v77_v40 = vmul.f32 %v76_v39, %v72_v38 }
  0x27   :  { %v78_v41 = vsel %vm73_vm7, 0.0, %v77_v40 }
  0x28   :  { %v79_v42 = vmul.f32 %v78_v41, %v56_v9  ;;  %v94_v43 = vadd.f32 %v78_v41, %v57_v31 }
  0x2a   :  { %v80_v44 = vmul.f32 %v79_v42, %v49_v30  ;;  %95 = vst [vmem:[%s200_s6] sm:$0xff] %v94_v43 }
  0x2c   :  { %v81_v45 = vmul.f32 %v80_v44, %v24_v3  ;;  %v85_v46 = vmul.f32 %v80_v44, %v29_v7  ;;  %v90_v47 = vmul.f32 %v80_v44, %v34_v8 }
  0x2e   :  { %v82_v48 = vadd.f32 %v81_v45, %v155_v0  ;;  %v86_v49 = vadd.f32 %v104_v2, %v85_v46  ;;  %v91_v50 = vadd.f32 %v106_v5, %v90_v47 }
  0x30   :  { %83 = vst [vmem:[%s201_s5] sm:$0xff] %v82_v48 }
  0x31   :  { %109 = vst [vmem:[%s201_s5 + $0x8] sm:$0xff] %v86_v49 }
  0x32   :  { %111 = vst [vmem:[%s201_s5 + $0x10] sm:$0xff] %v91_v50 }

</bundles_post_ra>
